<compile_context>
chip_gen: v7x
topology: tpu7x:2x2x1
jax: 0.10.0
libtpu: 0.0.40
codegen_flags: <defaults>
</compile_context>

<pallas_src>
import jax
import jax.numpy as jnp
from jax.experimental import pallas as pl
from jax.experimental.pallas import tpu as pltpu


def _cdiv(a, b):
    return (a + b - 1) // b


def _round_up(x, m):
    return ((x + m - 1) // m) * m


def simple_nn_kernel(x_ref, c_ref, w2t_ref, b3_ref, o_ref):
    x = x_ref[...]                                    # (TB, 1)  f32, batch on sublanes
    c = c_ref[...]                                    # (4, 64)  f32 packed constants
    w1r = c[0:1, :]                                   # (1, 64)  fc1.weight (row)
    b1r = c[1:2, :]                                   # (1, 64)  fc1.bias
    b2r = c[2:3, :]                                   # (1, 64)  fc2.bias
    w3r = c[3:4, :]                                   # (1, 64)  fc3.weight (row)

    # fc1: in_features == 1 -> rank-1 broadcast on the VPU, no MXU.
    h1 = jnp.maximum(x * w1r + b1r, 0.0)              # (TB, 64) f32

    # fc2: weight-stationary MXU matmul, single bf16 pass with f32 accumulation.
    h2 = jnp.dot(h1.astype(jnp.bfloat16), w2t_ref[...],
                 preferred_element_type=jnp.float32)  # (TB, 64) f32
    h2 = jnp.maximum(h2 + b2r, 0.0)                   # (TB, 64) f32

    # fc3: out_features == 1 -> VPU multiply + XLU cross-lane reduce, no MXU.
    out = jnp.sum(h2 * w3r, axis=-1, keepdims=True) + b3_ref[0]   # (TB, 1)
    o_ref[...] = out.astype(o_ref.dtype)


def _choose_tiling(B, tb_max):
    """Balanced batch tiling: minimal padding, >=2 tiles for v7x when B is big."""
    tiles = max(1, _cdiv(B, tb_max))
    if B >= 256 and tiles < 2:
        tiles = 2                       # keep both TensorCores busy on v7x
    tb = _round_up(_cdiv(B, tiles), 128)
    Bp = tb * tiles
    return tb, Bp, tiles


def simple_nn_forward(x, params, *, tb_max=8192):
    """x: (B, 1) float32 -> (B, 1) float32.  params in PyTorch nn.Linear layout."""
    w1, b1, w2, b2, w3, b3 = params     # (64,1),(64,),(64,64),(64,),(1,64),(1,)
    B = x.shape[0]

    tb, Bp, tiles = _choose_tiling(B, tb_max)

    # Kernel-side operand layouts.
    consts = jnp.stack([w1[:, 0], b1, b2, w3[0, :]], axis=0).astype(jnp.float32)  # (4, 64)
    w2t = w2.T.astype(jnp.bfloat16)                                               # (64, 64)
    b3s = b3.reshape((1,)).astype(jnp.float32)                                    # (1,) SMEM

    x_p = jnp.pad(x.astype(jnp.float32), ((0, Bp - B), (0, 0)))                   # (Bp, 1)

    out = pl.pallas_call(
        simple_nn_kernel,
        out_shape=jax.ShapeDtypeStruct((Bp, 1), jnp.float32),
        grid_spec=pltpu.PrefetchScalarGridSpec(
            num_scalar_prefetch=0,
            grid=(tiles,),
            in_specs=[
                pl.BlockSpec((tb, 1), lambda i: (i, 0)),            # x batch tile
                pl.BlockSpec((4, 64), lambda i: (0, 0)),            # packed consts, resident
                pl.BlockSpec((64, 64), lambda i: (0, 0)),           # w2^T bf16, resident
                pl.BlockSpec(memory_space=pltpu.MemorySpace.SMEM),  # b3 scalar
            ],
            out_specs=pl.BlockSpec((tb, 1), lambda i: (i, 0)),      # output batch tile
        ),
        compiler_params=pltpu.CompilerParams(
            dimension_semantics=("parallel",),   # shards batch tiles across TCs on v7x
        ),
    )(x_p, consts, w2t, b3s)

    return out[:B, :]


def init_params(key):
    # Deterministic init mimicking nn.Linear's U(-1/sqrt(fan_in), 1/sqrt(fan_in)),
    # with PyTorch layouts: weight (out, in), bias (out,).
    k = jax.random.split(key, 6)

    def uniform(kk, shape, fan_in):
        bound = 1.0 / jnp.sqrt(float(fan_in))
        return jax.random.uniform(kk, shape, jnp.float32, -bound, bound)

    w1 = uniform(k[0], (64, 1), 1)      # fc1.weight
    b1 = uniform(k[1], (64,), 1)        # fc1.bias
    w2 = uniform(k[2], (64, 64), 64)    # fc2.weight
    b2 = uniform(k[3], (64,), 64)       # fc2.bias
    w3 = uniform(k[4], (1, 64), 64)     # fc3.weight
    b3 = uniform(k[5], (1,), 64)        # fc3.bias
    return (w1, b1, w2, b2, w3, b3)


def reference_forward(x, params):
    # Pure f32 JAX reference of the PyTorch forward pass.
    w1, b1, w2, b2, w3, b3 = params
    h1 = jnp.maximum(x @ w1.T + b1, 0.0)
    h2 = jnp.maximum(h1 @ w2.T + b2, 0.0)
    return h2 @ w3.T + b3


if __name__ == "__main__":
    key = jax.random.PRNGKey(0)
    k_params, k_x1, k_x2, k_x3 = jax.random.split(key, 4)

    params = init_params(k_params)

    # bf16 MXU pass (f32 accumulation) -> loosened tolerance vs the f32 reference.
    ATOL = 5e-2
    RTOL = 5e-2

    # Small case matching the original module usage (batch=8, in_features=1).
    x_small = jax.random.normal(k_x1, (8, 1), jnp.float32)
    out_small = simple_nn_forward(x_small, params)
    jax.block_until_ready(out_small)
    ref_small = reference_forward(x_small, params)
    assert out_small.shape == (8, 1)
    assert jnp.allclose(out_small, ref_small, atol=ATOL, rtol=RTOL)

    # Exercise the multi-tile grid path (padding + 3 grid steps).
    x_mid = jax.random.normal(k_x2, (300, 1), jnp.float32)
    out_mid = simple_nn_forward(x_mid, params, tb_max=128)   # tiles=3, tb=128
    jax.block_until_ready(out_mid)
    ref_mid = reference_forward(x_mid, params)
    assert out_mid.shape == (300, 1)
    assert jnp.allclose(out_mid, ref_mid, atol=ATOL, rtol=RTOL)

    # Exercise the default tiling: B>=256 forces >=2 tiles (v7x dual-TC path),
    # balanced tb keeps padding small (tiles=2, tb=512, Bp=1024).
    x_big = jax.random.normal(k_x3, (1000, 1), jnp.float32)
    out_big = simple_nn_forward(x_big, params)
    jax.block_until_ready(out_big)
    ref_big = reference_forward(x_big, params)
    assert out_big.shape == (1000, 1)
    assert jnp.allclose(out_big, ref_big, atol=ATOL, rtol=RTOL)

    print("KERNEL_OK")
</pallas_src>

<mosaic_0001>
module attributes {stable_mosaic.version = 11 : i64} {
  func.func @simple_nn_kernel(%arg0: i32, %arg1: memref<128x1xf32, #tpu.memory_space<vmem>>, %arg2: memref<4x64xf32, #tpu.memory_space<vmem>>, %arg3: memref<64x64xbf16, #tpu.memory_space<vmem>>, %arg4: memref<1xf32, #tpu.memory_space<smem>>, %arg5: memref<128x1xf32, #tpu.memory_space<vmem>>) attributes {dimension_semantics = [#tpu.dimension_semantics<parallel>], iteration_bounds = array<i64: 1>, scalar_prefetch = 0 : i64, scratch_operands = 0 : i64, tpu.core_type = #tpu.core_type<tc>, window_params = [{transform_indices = @transform_0, window_bounds = array<i64: 128, 1>}, {pipeline_mode = #tpu.pipeline_mode<synchronous>, transform_indices = @transform_1, window_bounds = array<i64: 4, 64>}, {pipeline_mode = #tpu.pipeline_mode<synchronous>, transform_indices = @transform_2, window_bounds = array<i64: 64, 64>}, {transform_indices = @transform_3, window_bounds = array<i64: 1>}, {transform_indices = @transform_4, window_bounds = array<i64: 128, 1>}]} {
    %c0 = arith.constant 0 : index
    %c0_0 = arith.constant 0 : index
    %0 = vector.load %arg1[%c0, %c0_0] : memref<128x1xf32, #tpu.memory_space<vmem>>, vector<128x1xf32>
    %c0_1 = arith.constant 0 : index
    %c0_2 = arith.constant 0 : index
    %1 = vector.load %arg2[%c0_1, %c0_2] : memref<4x64xf32, #tpu.memory_space<vmem>>, vector<4x64xf32>
    %2 = vector.extract_strided_slice %1 {offsets = [0, 0], sizes = [1, 64], strides = [1, 1]} : vector<4x64xf32> to vector<1x64xf32>
    %3 = vector.extract_strided_slice %1 {offsets = [1, 0], sizes = [1, 64], strides = [1, 1]} : vector<4x64xf32> to vector<1x64xf32>
    %4 = vector.extract_strided_slice %1 {offsets = [2, 0], sizes = [1, 64], strides = [1, 1]} : vector<4x64xf32> to vector<1x64xf32>
    %5 = vector.extract_strided_slice %1 {offsets = [3, 0], sizes = [1, 64], strides = [1, 1]} : vector<4x64xf32> to vector<1x64xf32>
    %6 = vector.broadcast %0 : vector<128x1xf32> to vector<128x64xf32>
    %7 = vector.broadcast %2 : vector<1x64xf32> to vector<128x64xf32>
    %8 = arith.mulf %6, %7 : vector<128x64xf32>
    %9 = vector.broadcast %3 : vector<1x64xf32> to vector<128x64xf32>
    %10 = arith.addf %8, %9 : vector<128x64xf32>
    %cst = arith.constant 0.000000e+00 : f32
    %11 = vector.broadcast %cst : f32 to vector<128x64xf32>
    %12 = arith.maximumf %10, %11 : vector<128x64xf32>
    %13 = arith.truncf %12 : vector<128x64xf32> to vector<128x64xbf16>
    %c0_3 = arith.constant 0 : index
    %c0_4 = arith.constant 0 : index
    %14 = vector.load %arg3[%c0_3, %c0_4] : memref<64x64xbf16, #tpu.memory_space<vmem>>, vector<64x64xbf16>
    %cst_5 = arith.constant dense<0.000000e+00> : vector<128x64xf32>
    %15 = tpu.matmul %13, %14, %cst_5 {dimension_numbers = #tpu.dot_dimension_numbers<[1], [0], [0], [1], [0, 0, 1, 1], [], []>} : vector<128x64xbf16>, vector<64x64xbf16>, vector<128x64xf32> -> vector<128x64xf32>
    %16 = vector.broadcast %4 : vector<1x64xf32> to vector<128x64xf32>
    %17 = arith.addf %15, %16 : vector<128x64xf32>
    %cst_6 = arith.constant 0.000000e+00 : f32
    %18 = vector.broadcast %cst_6 : f32 to vector<128x64xf32>
    %19 = arith.maximumf %17, %18 : vector<128x64xf32>
    %20 = vector.broadcast %5 : vector<1x64xf32> to vector<128x64xf32>
    %21 = arith.mulf %19, %20 : vector<128x64xf32>
    %cst_7 = arith.constant dense<0.000000e+00> : vector<128xf32>
    %22 = vector.multi_reduction <add>, %21, %cst_7 [1] : vector<128x64xf32> to vector<128xf32>
    %23 = vector.shape_cast %22 : vector<128xf32> to vector<128x1xf32>
    %c0_8 = arith.constant 0 : index
    %24 = memref.load %arg4[%c0_8] : memref<1xf32, #tpu.memory_space<smem>>
    %25 = vector.broadcast %24 : f32 to vector<128x1xf32>
    %26 = arith.addf %23, %25 : vector<128x1xf32>
    %c0_9 = arith.constant 0 : index
    %c0_10 = arith.constant 0 : index
    %27 = vector.load %arg5[%c0_9, %c0_10] : memref<128x1xf32, #tpu.memory_space<vmem>>, vector<128x1xf32>
    tpu.vector_store %arg5[%c0_9, %c0_10], %26 {strides = array<i32>} : memref<128x1xf32, #tpu.memory_space<vmem>>, vector<128x1xf32>,
    return
  }
  func.func @transform_0(%arg0: i32) -> (i32, i32) {
    %c0_i32 = arith.constant 0 : i32
    %c0_i32_0 = arith.constant 0 : i32
    return %arg0, %c0_i32 : i32, i32
  }
  func.func @transform_1(%arg0: i32) -> (i32, i32) {
    %c0_i32 = arith.constant 0 : i32
    %c0_i32_0 = arith.constant 0 : i32
    %c0_i32_1 = arith.constant 0 : i32
    return %c0_i32, %c0_i32_0 : i32, i32
  }
  func.func @transform_2(%arg0: i32) -> (i32, i32) {
    %c0_i32 = arith.constant 0 : i32
    %c0_i32_0 = arith.constant 0 : i32
    %c0_i32_1 = arith.constant 0 : i32
    return %c0_i32, %c0_i32_0 : i32, i32
  }
  func.func @transform_3(%arg0: i32) -> i32 {
    %c0_i32 = arith.constant 0 : i32
    %c0_i32_0 = arith.constant 0 : i32
    return %c0_i32 : i32
  }
  func.func @transform_4(%arg0: i32) -> (i32, i32) {
    %c0_i32 = arith.constant 0 : i32
    %c0_i32_0 = arith.constant 0 : i32
    return %arg0, %c0_i32 : i32, i32
  }
}

</mosaic_0001>

<bundles_post_ra>
// kernel: tpu_custom_call.1
= control target key start
LH: loop header
LB: loop body
LE: loop exit
PB: predicated region body
PF: predicated region fallthrough
CT: control target
= control target key end

     0   :  { %v524_v0 = vmov 0   ;;  %v116_v21 = vlaneseq  ;;  %vm216_vm0 = vcmask 523264   ;;  %vm440_vm1 = vcmask 7168   ;;  %s788_s0 = inlined_call_operand.vmem [shape: f32[128,1], index: 0, kind: input, shape index: {}]   ;;  %s789_s2 = inlined_call_operand.vmem [shape: bf16[64,64], index: 2, kind: input, shape index: {}]   ;;  %s790_s1 = inlined_call_operand.vmem [shape: f32[4,64], index: 1, kind: input, shape index: {}]   ;;  %s791_s3 = inlined_call_operand.<no memory space> [shape: f32[1], index: 3, kind: input, shape index: {}]   ;;  %s792_s4 = inlined_call_operand.vmem [shape: f32[128,1], index: 4, kind: output, shape index: {}]  }
   0x1   :  { %519 = vset.pattern.permute.xlu1 %v524_v0  ;;  %518 = vset.pattern.permute.xlu0 %v524_v0  ;;  %v27_v1 = vld [vmem:[%s788_s0 + $0x40] sm:$0xff]  ;;  %v28_v3 = vld [vmem:[%s788_s0 + $0x48] sm:$0xff]  ;;  %v22_v5 = vld [vmem:[%s788_s0 + $0x18] sm:$0xff] }
   0x2   :  { %v19_v2 = vld [vmem:[%s788_s0] sm:$0xff]  ;;  %78 = vperm.xlu1 %519, %v27_v1   ;;  %v20_v4 = vld [vmem:[%s788_s0 + $0x8] sm:$0xff]  ;;  %v21_v6 = vld [vmem:[%s788_s0 + $0x10] sm:$0xff]  ;;  %v610_v22 = vshrl.u32 %v116_v21, 7 }
   0x3   :  { %38 = vperm.xlu0 %518, %v19_v2   ;;  %v520_v7 = vld [vmem:[%s789_s2] sm:$0xff]   ;;  %v521_v8 = vld [vmem:[%s789_s2 + $0x8] sm:$0xff]   ;;  %v30_v9 = vld [vmem:[%s788_s0 + $0x58] sm:$0xff] }
   0x4   :  { %485 = vmatprep.subr.bf16.mxu0 %v520_v7  ;;  %509 = vmatprep.subr.bf16.mxu1 %v520_v7  ;;  %v29_v10 = vld [vmem:[%s788_s0 + $0x50] sm:$0xff]  ;;  %v24_v12 = vld [vmem:[%s788_s0 + $0x28] sm:$0xff]  ;;  %v23_v13 = vld [vmem:[%s788_s0 + $0x20] sm:$0xff]  ;;  %v118_v23 = vsub.s32 0, %v610_v22  ;;  %v138_v25 = vsub.s32 1, %v610_v22 }
   0x5   :  { %486 = vmatpush3.bf16.msra.mxu0 %v520_v7  ;;  %513 = vmatpush3.bf16.msra.mxu1 %v520_v7  ;;  %v522_v11 = vld [vmem:[%s789_s2 + $0x10] sm:$0xff]   ;;  %v523_v14 = vld [vmem:[%s789_s2 + $0x18] sm:$0xff]   ;;  %v32_v15 = vld [vmem:[%s788_s0 + $0x68] sm:$0xff] }
   0x6   :  { %83 = vperm.xlu1 %519, %v28_v3   ;;  %487 = vmatprep.subr.bf16.mxu0 %v521_v8  ;;  %v31_v16 = vld [vmem:[%s788_s0 + $0x60] sm:$0xff]  ;;  %v26_v17 = vld [vmem:[%s788_s0 + $0x38] sm:$0xff]  ;;  %v25_v18 = vld [vmem:[%s788_s0 + $0x30] sm:$0xff] }
   0x7   :  { %43 = vperm.xlu0 %518, %v20_v4   ;;  %510 = vmatprep.subr.bf16.mxu1 %v521_v8  ;;  %v34_v19 = vld [vmem:[%s788_s0 + $0x78] sm:$0xff]  ;;  %v33_v20 = vld [vmem:[%s788_s0 + $0x70] sm:$0xff]  ;;  %v616_v24 = vld [vmem:[%s790_s1] sm:$0xf] }
   0x8   :  { %v620_v26 = vrot.slane %v616_v24, %v118_v23  ;;  %v623_v27 = vrot.slane %v616_v24, %v138_v25 }
   0x9   :  { %488 = vmatpush3.bf16.msra.mxu0 %v521_v8  ;;  %514 = vmatpush3.bf16.msra.mxu1 %v521_v8 }
   0xa   :  { %53 = vperm.xlu1 %519, %v22_v5   ;;  %489 = vmatprep.subr.bf16.mxu0 %v522_v11 }
   0xb   :  { %48 = vperm.xlu0 %518, %v21_v6   ;;  %511 = vmatprep.subr.bf16.mxu1 %v522_v11 }
   0xd   :  { %490 = vmatpush3.bf16.msra.mxu0 %v522_v11  ;;  %515 = vmatpush3.bf16.msra.mxu1 %v522_v11 }
   0xe   :  { %93 = vperm.xlu1 %519, %v30_v9   ;;  %491 = vmatprep.subr.bf16.mxu0 %v523_v14 }
   0xf   :  { %88 = vperm.xlu0 %518, %v29_v10   ;;  %512 = vmatprep.subr.bf16.mxu1 %v523_v14 }
  0x11   :  { %492 = vmatpush3.bf16.msra.mxu0 %v523_v14  ;;  %516 = vmatpush3.bf16.msra.mxu1 %v523_v14 }
  0x12   :  { %63 = vperm.xlu1 %519, %v24_v12  }
  0x13   :  { %58 = vperm.xlu0 %518, %v23_v13  }
  0x16   :  { %103 = vperm.xlu1 %519, %v32_v15  }
  0x17   :  { %98 = vperm.xlu0 %518, %v31_v16  }
  0x1a   :  { %73 = vperm.xlu1 %519, %v26_v17  }
  0x1b   :  { %68 = vperm.xlu0 %518, %v25_v18  }
  0x1e   :  { %113 = vperm.xlu1 %519, %v34_v19  }
  0x1f   :  { %108 = vperm.xlu0 %518, %v33_v20  }
  0x81   :  { %v79_v28 = vpop.permute.xlu1 %78 }
  0x82   :  { %v39_v29 = vpop.permute.xlu0 %38  ;;  %v128_v30 = vmul.f32 %v620_v26, %v79_v28 }
  0x83   :  { %v120_v31 = vmul.f32 %v620_v26, %v39_v29 }
  0x84   :  { %v148_v32 = vadd.f32 %v623_v27, %v128_v30 }
  0x85   :  { %v140_v33 = vadd.f32 %v623_v27, %v120_v31  ;;  %v84_v34 = vpop.permute.xlu1 %83 }
  0x86   :  { %v44_v35 = vpop.permute.xlu0 %43  ;;  %v129_v36 = vmul.f32 %v620_v26, %v84_v34  ;;  %v164_v40 = vmax.f32 %v148_v32, 0.0 }
  0x87   :  { %v121_v37 = vmul.f32 %v620_v26, %v44_v35  ;;  %v156_v41 = vmax.f32 %v140_v33, 0.0 }
  0x88   :  { %v149_v38 = vadd.f32 %v623_v27, %v129_v36 }
  0x89   :  { %v141_v39 = vadd.f32 %v623_v27, %v121_v37  ;;  %v54_v42 = vpop.permute.xlu1 %53 }
  0x8a   :  { %v49_v43 = vpop.permute.xlu0 %48  ;;  %v165_v44 = vmax.f32 %v149_v38, 0.0  ;;  %v123_v46 = vmul.f32 %v620_v26, %v54_v42 }
  0x8b   :  { %v157_v45 = vmax.f32 %v141_v39, 0.0  ;;  %v122_v47 = vmul.f32 %v620_v26, %v49_v43 }
  0x8c   :  { %v143_v48 = vadd.f32 %v623_v27, %v123_v46  ;;  %v176_v51 = vpack.c.bf16 %v165_v44, %v164_v40  ;;  %v190_v40 = vsub.s32 2, %v610_v22 }
  0x8d   :  { %v142_v49 = vadd.f32 %v623_v27, %v122_v47  ;;  %v172_v50 = vpack.c.bf16 %v157_v45, %v156_v41  ;;  %v94_v52 = vpop.permute.xlu1 %93 }
  0x8e   :  { %v89_v53 = vpop.permute.xlu0 %88  ;;  %v159_v54 = vmax.f32 %v143_v48, 0.0  ;;  %v131_v56 = vmul.f32 %v620_v26, %v94_v52  ;;  %501 = vmatprep.mubr.msk.bf16.mxu1 %vm216_vm0, %v176_v51  ;;  %v667_v41 = vrot.slane %v616_v24, %v190_v40 }
  0x8f   :  { %v158_v55 = vmax.f32 %v142_v49, 0.0  ;;  %v130_v57 = vmul.f32 %v620_v26, %v89_v53  ;;  %493 = vmatprep.mubr.msk.bf16.mxu0 %vm216_vm0, %v172_v50 }
  0x90   :  { %v151_v59 = vadd.f32 %v623_v27, %v131_v56 }
  0x91   :  { %v173_v58 = vpack.c.bf16 %v159_v54, %v158_v55  ;;  %v150_v60 = vadd.f32 %v623_v27, %v130_v57  ;;  %v64_v61 = vpop.permute.xlu1 %63 }
  0x92   :  { %v59_v62 = vpop.permute.xlu0 %58  ;;  %v167_v63 = vmax.f32 %v151_v59, 0.0  ;;  %v125_v1 = vmul.f32 %v620_v26, %v64_v61 }
  0x93   :  { %v166_v0 = vmax.f32 %v150_v60, 0.0  ;;  %v124_v2 = vmul.f32 %v620_v26, %v59_v62  ;;  %494 = vmatmul.mubr.msk.bf16.vlgmr.msra.gmra.mrb[0].mxu0 %vm216_vm0, %v173_v58 }
  0x94   :  { %v145_v4 = vadd.f32 %v623_v27, %v125_v1 }
  0x95   :  { %v177_v3 = vpack.c.bf16 %v167_v63, %v166_v0  ;;  %v144_v5 = vadd.f32 %v623_v27, %v124_v2  ;;  %v104_v6 = vpop.permute.xlu1 %103 }
  0x96   :  { %v99_v7 = vpop.permute.xlu0 %98  ;;  %v161_v8 = vmax.f32 %v145_v4, 0.0  ;;  %v133_v10 = vmul.f32 %v620_v26, %v104_v6 }
  0x97   :  { %v160_v9 = vmax.f32 %v144_v5, 0.0  ;;  %v132_v11 = vmul.f32 %v620_v26, %v99_v7  ;;  %502 = vmatmul.mubr.msk.bf16.vlgmr.msra.gmra.mrb[0].mxu1 %vm216_vm0, %v177_v3 }
  0x98   :  { %v153_v13 = vadd.f32 %v623_v27, %v133_v10 }
  0x99   :  { %v174_v12 = vpack.c.bf16 %v161_v8, %v160_v9  ;;  %v152_v14 = vadd.f32 %v623_v27, %v132_v11  ;;  %v74_v15 = vpop.permute.xlu1 %73 }
  0x9a   :  { %v69_v16 = vpop.permute.xlu0 %68  ;;  %v169_v17 = vmax.f32 %v153_v13, 0.0  ;;  %v127_v19 = vmul.f32 %v620_v26, %v74_v15 }
  0x9b   :  { %v168_v18 = vmax.f32 %v152_v14, 0.0  ;;  %v126_v20 = vmul.f32 %v620_v26, %v69_v16  ;;  %497 = vmatprep.mubr.msk.bf16.mxu0 %vm216_vm0, %v174_v12 }
  0x9c   :  { %v147_v23 = vadd.f32 %v623_v27, %v127_v19 }
  0x9d   :  { %v178_v21 = vpack.c.bf16 %v169_v17, %v168_v18  ;;  %v146_v25 = vadd.f32 %v623_v27, %v126_v20  ;;  %v114_v28 = vpop.permute.xlu1 %113 }
  0x9e   :  { %v109_v29 = vpop.permute.xlu0 %108  ;;  %v163_v30 = vmax.f32 %v147_v23, 0.0  ;;  %v135_v32 = vmul.f32 %v620_v26, %v114_v28 }
  0x9f   :  { %v162_v31 = vmax.f32 %v146_v25, 0.0  ;;  %v134_v33 = vmul.f32 %v620_v26, %v109_v29  ;;  %505 = vmatprep.mubr.msk.bf16.mxu1 %vm216_vm0, %v178_v21  ;;  %v356_v26 = vsub.s32 3, %v610_v22 }
  0xa0   :  { %v155_v35 = vadd.f32 %v623_v27, %v135_v32 }
  0xa1   :  { %v175_v34 = vpack.c.bf16 %v163_v30, %v162_v31  ;;  %v154_v36 = vadd.f32 %v623_v27, %v134_v33  ;;  %v672_v27 = vrot.slane %v616_v24, %v356_v26 }
  0xa2   :  { %v171_v37 = vmax.f32 %v155_v35, 0.0 }
  0xa3   :  { %v170_v38 = vmax.f32 %v154_v36, 0.0  ;;  %498 = vmatmul.mubr.msk.bf16.gmra.mrb[4].mxu0 %vm216_vm0, %v175_v34 }
  0xa5   :  { %v179_v39 = vpack.c.bf16 %v171_v37, %v170_v38 }
  0xa7   :  { %506 = vmatmul.mubr.msk.bf16.gmra.mrb[4].mxu1 %vm216_vm0, %v179_v39 }
 0x166   :  { %v495_v42 = vpop.f32.mrb[0].mxu0 }
 0x167   :  { %v284_v43 = vadd.f32 %v495_v42, %v667_v41  ;;  %v275_v44 = vpop.f32.mrb[1].mxu0 }
 0x168   :  { %v276_v45 = vadd.f32 %v275_v44, %v667_v41  ;;  %v496_v46 = vpop.f32.mrb[2].mxu0 }
 0x169   :  { %v340_v47 = vmax.f32 %v284_v43, 0.0  ;;  %v287_v48 = vadd.f32 %v496_v46, %v667_v41  ;;  %v278_v49 = vpop.f32.mrb[3].mxu0 }
 0x16a   :  { %v338_v50 = vmax.f32 %v276_v45, 0.0  ;;  %v503_v51 = vpop.f32.mrb[0].mxu1  ;;  %v279_v55 = vadd.f32 %v278_v49, %v667_v41 }
 0x16b   :  { %v316_v52 = vadd.f32 %v503_v51, %v667_v41  ;;  %v307_v53 = vpop.f32.mrb[1].mxu1  ;;  %v360_v22 = vmul.f32 %v672_v27, %v340_v47  ;;  %v341_v54 = vmax.f32 %v287_v48, 0.0 }
 0x16c   :  { %v308_v24 = vadd.f32 %v307_v53, %v667_v41  ;;  %v504_v56 = vpop.f32.mrb[2].mxu1  ;;  %v358_v61 = vmul.f32 %v672_v27, %v338_v50  ;;  %v339_v0 = vmax.f32 %v279_v55, 0.0 }
 0x16d   :  { %v348_v57 = vmax.f32 %v316_v52, 0.0  ;;  %v319_v58 = vadd.f32 %v504_v56, %v667_v41  ;;  %v310_v59 = vpop.f32.mrb[3].mxu1  ;;  %v380_v60 = vsel %vm216_vm0, %v360_v22, 0.0  ;;  %v361_v2 = vmul.f32 %v672_v27, %v341_v54 }
 0x16e   :  { %v346_v62 = vmax.f32 %v308_v24, 0.0  ;;  %381 = vadd.xlane.f32.xlu0 %v380_v60  ;;  %v311_v1 = vadd.f32 %v310_v59, %v667_v41  ;;  %v374_v4 = vsel %vm216_vm0, %v358_v61, 0.0  ;;  %v359_v7 = vmul.f32 %v672_v27, %v339_v0 }
 0x16f   :  { %v368_v63 = vmul.f32 %v672_v27, %v348_v57  ;;  %v349_v3 = vmax.f32 %v319_v58, 0.0  ;;  %v383_v9 = vsel %vm216_vm0, %v361_v2, 0.0  ;;  %v423_v57 = vstv %s791_s3 }
 0x170   :  { %v366_v6 = vmul.f32 %v672_v27, %v346_v62  ;;  %v347_v8 = vmax.f32 %v311_v1, 0.0  ;;  %v377_v17 = vsel %vm216_vm0, %v359_v7, 0.0 }
 0x171   :  { %v404_v5 = vsel %vm216_vm0, %v368_v63, 0.0  ;;  %v369_v11 = vmul.f32 %v672_v27, %v349_v3 }
 0x172   :  { %375 = vadd.xlane.f32.xlu0 %v374_v4  ;;  %405 = vadd.xlane.f32.xlu1 %v404_v5  ;;  %v398_v10 = vsel %vm216_vm0, %v366_v6, 0.0  ;;  %v367_v23 = vmul.f32 %v672_v27, %v347_v8 }
 0x173   :  { %v407_v21 = vsel %vm216_vm0, %v369_v11, 0.0 }
 0x174   :  { %v401_v39 = vsel %vm216_vm0, %v367_v23, 0.0 }
 0x176   :  { %384 = vadd.xlane.f32.xlu0 %v383_v9  ;;  %399 = vadd.xlane.f32.xlu1 %v398_v10  ;;  %v499_v12 = vpop.f32.mrb[4].mxu0 }
 0x177   :  { %v300_v13 = vadd.f32 %v499_v12, %v667_v41  ;;  %v291_v14 = vpop.f32.mrb[5].mxu0 }
 0x178   :  { %v292_v15 = vadd.f32 %v291_v14, %v667_v41  ;;  %v500_v16 = vpop.f32.mrb[6].mxu0 }
 0x179   :  { %v344_v18 = vmax.f32 %v300_v13, 0.0  ;;  %v303_v19 = vadd.f32 %v500_v16, %v667_v41  ;;  %v294_v20 = vpop.f32.mrb[7].mxu0 }
 0x17a   :  { %v342_v25 = vmax.f32 %v292_v15, 0.0  ;;  %v295_v28 = vadd.f32 %v294_v20, %v667_v41  ;;  %408 = vadd.xlane.f32.xlu0 %v407_v21  ;;  %378 = vadd.xlane.f32.xlu1 %v377_v17  ;;  %v507_v29 = vpop.f32.mrb[4].mxu1 }
 0x17b   :  { %v345_v30 = vmax.f32 %v303_v19, 0.0  ;;  %v323_v31 = vpop.f32.mrb[5].mxu1  ;;  %v364_v32 = vmul.f32 %v672_v27, %v344_v18  ;;  %v332_v33 = vadd.f32 %v507_v29, %v667_v41 }
 0x17c   :  { %v324_v34 = vadd.f32 %v323_v31, %v667_v41  ;;  %v508_v35 = vpop.f32.mrb[6].mxu1  ;;  %v362_v36 = vmul.f32 %v672_v27, %v342_v25  ;;  %v343_v37 = vmax.f32 %v295_v28, 0.0 }
 0x17d   :  { %v326_v38 = vpop.f32.mrb[7].mxu1  ;;  %v392_v40 = vsel %vm216_vm0, %v364_v32, 0.0  ;;  %v365_v26 = vmul.f32 %v672_v27, %v345_v30  ;;  %v352_v44 = vmax.f32 %v332_v33, 0.0  ;;  %v335_v45 = vadd.f32 %v508_v35, %v667_v41 }
 0x17e   :  { %v350_v42 = vmax.f32 %v324_v34, 0.0  ;;  %v327_v43 = vadd.f32 %v326_v38, %v667_v41  ;;  %402 = vadd.xlane.f32.xlu0 %v401_v39  ;;  %393 = vadd.xlane.f32.xlu1 %v392_v40  ;;  %v386_v46 = vsel %vm216_vm0, %v362_v36, 0.0  ;;  %v363_v49 = vmul.f32 %v672_v27, %v343_v37 }
 0x17f   :  { %v395_v48 = vsel %vm216_vm0, %v365_v26, 0.0  ;;  %v353_v51 = vmax.f32 %v335_v45, 0.0  ;;  %v372_v41 = vmul.f32 %v672_v27, %v352_v44 }
 0x180   :  { %v351_v47 = vmax.f32 %v327_v43, 0.0  ;;  %v370_v50 = vmul.f32 %v672_v27, %v350_v42  ;;  %v389_v52 = vsel %vm216_vm0, %v363_v49, 0.0 }
 0x181   :  { %v416_v55 = vsel %vm216_vm0, %v372_v41, 0.0  ;;  %v373_v24 = vmul.f32 %v672_v27, %v353_v51 }
 0x182   :  { %396 = vadd.xlane.f32.xlu0 %v395_v48  ;;  %387 = vadd.xlane.f32.xlu1 %v386_v46  ;;  %v410_v53 = vsel %vm216_vm0, %v370_v50, 0.0  ;;  %v371_v22 = vmul.f32 %v672_v27, %v351_v47 }
 0x183   :  { %v419_v56 = vsel %vm216_vm0, %v373_v24, 0.0 }
 0x184   :  { %v413_v54 = vsel %vm216_vm0, %v371_v22, 0.0 }
 0x186   :  { %390 = vadd.xlane.f32.xlu0 %v389_v52  ;;  %411 = vadd.xlane.f32.xlu1 %v410_v53 }
 0x18a   :  { %414 = vadd.xlane.f32.xlu0 %v413_v54  ;;  %417 = vadd.xlane.f32.xlu1 %v416_v55 }
 0x18e   :  { %420 = vadd.xlane.f32.xlu0 %v419_v56 }
 0x1fb   :  { %v382_v58 = vpop.xlane.xlu0 %381 }
 0x1fc   :  { %v426_v59 = vadd.f32 %v423_v57, %v382_v58 }
 0x1fe   :  { %443 = vst.msk [vmem:[%s792_s4 + $0x10] sm:$0xff] %vm440_vm1, %v426_v59 }
 0x1ff   :  { %v406_v60 = vpop.xlane.xlu1 %405  ;;  %v376_v61 = vpop.xlane.xlu0 %375 }
 0x200   :  { %v434_v27 = vadd.f32 %v423_v57, %v406_v60  ;;  %v424_v62 = vadd.f32 %v423_v57, %v376_v61 }
 0x202   :  { %451 = vst.msk [vmem:[%s792_s4 + $0x50] sm:$0xff] %vm440_vm1, %v434_v27  ;;  %441 = vst.msk [vmem:[%s792_s4] sm:$0xff] %vm440_vm1, %v424_v62 }
 0x203   :  { %v400_v63 = vpop.xlane.xlu1 %399  ;;  %v385_v0 = vpop.xlane.xlu0 %384 }
 0x204   :  { %v432_v1 = vadd.f32 %v423_v57, %v400_v63  ;;  %v427_v2 = vadd.f32 %v423_v57, %v385_v0 }
 0x206   :  { %449 = vst.msk [vmem:[%s792_s4 + $0x40] sm:$0xff] %vm440_vm1, %v432_v1  ;;  %444 = vst.msk [vmem:[%s792_s4 + $0x18] sm:$0xff] %vm440_vm1, %v427_v2 }
 0x207   :  { %v379_v3 = vpop.xlane.xlu1 %378  ;;  %v409_v4 = vpop.xlane.xlu0 %408 }
 0x208   :  { %v425_v5 = vadd.f32 %v423_v57, %v379_v3  ;;  %v435_v6 = vadd.f32 %v423_v57, %v409_v4 }
 0x20a   :  { %442 = vst.msk [vmem:[%s792_s4 + $0x8] sm:$0xff] %vm440_vm1, %v425_v5  ;;  %452 = vst.msk [vmem:[%s792_s4 + $0x58] sm:$0xff] %vm440_vm1, %v435_v6 }
 0x20b   :  { %v394_v7 = vpop.xlane.xlu1 %393  ;;  %v403_v8 = vpop.xlane.xlu0 %402 }
 0x20c   :  { %v430_v9 = vadd.f32 %v423_v57, %v394_v7  ;;  %v433_v10 = vadd.f32 %v423_v57, %v403_v8 }
 0x20e   :  { %447 = vst.msk [vmem:[%s792_s4 + $0x30] sm:$0xff] %vm440_vm1, %v430_v9  ;;  %450 = vst.msk [vmem:[%s792_s4 + $0x48] sm:$0xff] %vm440_vm1, %v433_v10 }
 0x20f   :  { %v388_v11 = vpop.xlane.xlu1 %387  ;;  %v397_v12 = vpop.xlane.xlu0 %396 }
 0x210   :  { %v428_v13 = vadd.f32 %v423_v57, %v388_v11  ;;  %v431_v14 = vadd.f32 %v423_v57, %v397_v12 }
 0x212   :  { %445 = vst.msk [vmem:[%s792_s4 + $0x20] sm:$0xff] %vm440_vm1, %v428_v13  ;;  %448 = vst.msk [vmem:[%s792_s4 + $0x38] sm:$0xff] %vm440_vm1, %v431_v14 }
 0x213   :  { %v412_v15 = vpop.xlane.xlu1 %411  ;;  %v391_v16 = vpop.xlane.xlu0 %390 }
 0x214   :  { %v436_v17 = vadd.f32 %v423_v57, %v412_v15  ;;  %v429_v18 = vadd.f32 %v423_v57, %v391_v16 }
 0x216   :  { %453 = vst.msk [vmem:[%s792_s4 + $0x60] sm:$0xff] %vm440_vm1, %v436_v17  ;;  %446 = vst.msk [vmem:[%s792_s4 + $0x28] sm:$0xff] %vm440_vm1, %v429_v18 }
 0x217   :  { %v418_v19 = vpop.xlane.xlu1 %417  ;;  %v415_v20 = vpop.xlane.xlu0 %414 }
 0x218   :  { %v438_v21 = vadd.f32 %v423_v57, %v418_v19  ;;  %v437_v23 = vadd.f32 %v423_v57, %v415_v20 }
 0x21a   :  { %455 = vst.msk [vmem:[%s792_s4 + $0x70] sm:$0xff] %vm440_vm1, %v438_v21  ;;  %454 = vst.msk [vmem:[%s792_s4 + $0x68] sm:$0xff] %vm440_vm1, %v437_v23 }
 0x21b   :  { %v421_v25 = vpop.xlane.xlu0 %420 }
 0x21c   :  { %v439_v28 = vadd.f32 %v423_v57, %v421_v25 }
 0x21e   :  { %456 = vst.msk [vmem:[%s792_s4 + $0x78] sm:$0xff] %vm440_vm1, %v439_v28 }

</bundles_post_ra>
